<compile_context>
chip_gen: v5e
topology: v5e:2x2
jax: 0.10.0
libtpu: 0.0.40
codegen_flags: <defaults>
</compile_context>

<pallas_src>
import jax
import jax.numpy as jnp
from jax import lax
from jax.experimental import pallas as pl
from jax.experimental.pallas import tpu as pltpu


def net_kernel(x_ref,
               w0_ref, b0_ref,
               w1_ref, b1_ref,
               w2_ref, b2_ref,
               h1w_ref, h1b_ref,
               wd_ref, bd_ref,
               out_ref):
    x = x_ref[...]                                              # [tb, F_in]

    # layer1.f0 + relu0 : contract W0[16,32] with x's feature axis -> [16, tb]
    h = lax.dot_general(w0_ref[...], x, (((1,), (1,)), ((), ())),
                        preferred_element_type=jnp.float32) + b0_ref[...]
    h = jnp.maximum(h, 0.0)                                     # [16, tb]

    # layer1.f1 + relu1
    h = jnp.dot(w1_ref[...], h, preferred_element_type=jnp.float32) + b1_ref[...]
    h = jnp.maximum(h, 0.0)                                     # [16, tb]

    # layer1.f2 : SparseLinear(mtx, residual_connect).  Effective weight
    # (w2 * mask2 + res2) folded once outside the kernel; no trailing ReLU.
    # TODO(synk): SparseLinear's source is not in the provided module; modeled
    # as (trainable weight * partition mask + fixed residual weights) + bias.
    h = jnp.dot(w2_ref[...], h, preferred_element_type=jnp.float32) + b2_ref[...]   # [8, tb]

    # layer2.h1 + h_relu1 + h_drop1
    # TODO(synk): nn.Dropout modeled as identity (inference/eval mode).
    h = jnp.dot(h1w_ref[...], h, preferred_element_type=jnp.float32) + h1b_ref[...]
    h = jnp.maximum(h, 0.0)                                     # [8, tb]

    # layer2.h2 + Softmax(dim=-1).  For 2 classes softmax is exactly
    # sigmoid(l1 - l0); w_diff/b_diff are pre-folded so only one row is
    # computed and both rows are written with a single lane-dense store.
    d = jnp.dot(wd_ref[...], h, preferred_element_type=jnp.float32) + bd_ref[...]   # [1, tb]
    p1 = 1.0 / (1.0 + jnp.exp(-d))
    out_ref[...] = jnp.concatenate([1.0 - p1, p1], axis=0)      # [2, tb]


def prepare_params(p):
    """Batch-independent parameter prep (done once, outside the kernel)."""
    w2eff = p["w2"] * p["mask2"] + p["res2"]
    w_diff = p["h2w"][1:2, :] - p["h2w"][0:1, :]     # [1, 8]
    b_diff = p["h2b"][1:2, :] - p["h2b"][0:1, :]     # [1, 1]
    return {
        "w0": p["w0"], "b0": p["b0"],
        "w1": p["w1"], "b1": p["b1"],
        "w2eff": w2eff, "b2": p["b2"],
        "h1w": p["h1w"], "h1b": p["h1b"],
        "wd": w_diff, "bd": b_diff,
    }


def _round_up(x, m):
    return ((x + m - 1) // m) * m


def net_forward(x, prep, *, tb=None):
    """Fused Net forward as a single Pallas kernel.

    x: [B, F_in] float32 (native PyTorch layout).  Returns [B, 2] float32.
    """
    B, F_in = x.shape
    n_out = 2

    # --- batch-tile selection ------------------------------------------------
    # Single step for small batches (block == full array, no (8,128) rule).
    # For large batches use big 128-multiple tiles: per-step DMA amortizes the
    # ~0.35us fixed grid cost, and >=4 steps lets v7x shard across its 2 TCs.
    # Cap at 32768 so x double-buffer (2*4MiB) + f32 intermediates fit the
    # default scoped-VMEM limit on every generation (incl. v7x's 64MiB VMEM).
    if tb is None:
        if B <= 4096:
            tb_eff = B
        else:
            tb_eff = min(32768, _round_up(pl.cdiv(B, 4), 128))
    else:
        tb_eff = tb
    if tb_eff >= B:
        tb_eff = B
    else:
        tb_eff = _round_up(tb_eff, 128)          # lane-dense output tiles
        if tb_eff >= B:
            tb_eff = B
    grid = (pl.cdiv(B, tb_eff),)                 # partial last tile allowed

    ordered = [prep[k] for k in
               ("w0", "b0", "w1", "b1", "w2eff", "b2", "h1w", "h1b", "wd", "bd")]

    # Constant-index parameter blocks (<10 KiB total) stay resident in VMEM;
    # the block index never changes so they are fetched once.
    def const_spec(a):
        return pl.BlockSpec(a.shape, lambda i: (0, 0))

    in_specs = [pl.BlockSpec((tb_eff, F_in), lambda i: (i, 0))]   # contiguous x slab
    in_specs += [const_spec(a) for a in ordered]

    flops = 2 * B * (F_in * 16 + 16 * 16 + 16 * 8 + 8 * 8 + 8 * 1)
    param_bytes = int(sum(a.size for a in ordered)) * 4
    cost = pl.CostEstimate(flops=int(flops),
                           transcendentals=int(B),
                           bytes_accessed=int(B * (F_in + n_out) * 4 + param_bytes))

    out_t = pl.pallas_call(
        net_kernel,
        out_shape=jax.ShapeDtypeStruct((n_out, B), jnp.float32),
        grid=grid,
        in_specs=in_specs,
        out_specs=pl.BlockSpec((n_out, tb_eff), lambda i: (0, i)),
        compiler_params=pltpu.CompilerParams(
            dimension_semantics=("parallel",)),
        cost_estimate=cost,
    )(x, *ordered)

    # Lane-dense [2, B] kernel output; transpose back to the PyTorch [B, 2]
    # layout for the caller (skip if the consumer accepts [2, B]).
    return out_t.T


def net_forward_ref(x, p):
    """Pure-JAX reference (PyTorch semantics) for correctness checking."""
    h = jnp.maximum(x @ p["w0"].T + p["b0"].T, 0.0)
    h = jnp.maximum(h @ p["w1"].T + p["b1"].T, 0.0)
    w_eff = p["w2"] * p["mask2"] + p["res2"]
    h = h @ w_eff.T + p["b2"].T            # SparseLinear: no trailing ReLU
    h = jnp.maximum(h @ p["h1w"].T + p["h1b"].T, 0.0)
    logits = h @ p["h2w"].T + p["h2b"].T
    return jax.nn.softmax(logits, axis=-1)


def init_params(key):
    # partition_mtx_dict shapes:
    #   p0: (32, 16)  -> Linear(32, 16)
    #   p1: (16, 16)  -> Linear(16, 16)
    #   p2: (16, 8)   -> SparseLinear(mtx, residual_connect)
    # num_hidden_layer_neuron_list = [8]  -> layer2 dims [8, 8, 2]
    # Weights in PyTorch nn.Linear layout [out, in]; biases [out, 1].
    ks = jax.random.split(key, 14)
    f32 = jnp.float32

    def w(k, shape, scale=0.1):
        return (scale * jax.random.normal(k, shape)).astype(f32)

    params = {
        "w0": w(ks[0], (16, 32)),
        "b0": w(ks[1], (16, 1), scale=0.05),
        "w1": w(ks[2], (16, 16)),
        "b1": w(ks[3], (16, 1), scale=0.05),
        "w2": w(ks[4], (8, 16)),
        "mask2": (jax.random.uniform(ks[5], (8, 16)) < 0.5).astype(f32),
        "res2": w(ks[6], (8, 16), scale=0.05),
        "b2": w(ks[7], (8, 1), scale=0.05),
        "h1w": w(ks[8], (8, 8)),
        "h1b": w(ks[9], (8, 1), scale=0.05),
        "h2w": w(ks[10], (2, 8)),
        "h2b": w(ks[11], (2, 1), scale=0.05),
    }
    return params, ks[12]


if __name__ == "__main__":
    params, xkey = init_params(jax.random.PRNGKey(0))
    prep = prepare_params(params)

    # Case 1: small batch -> single grid step, block == full array.
    B = 16
    x = jax.random.normal(xkey, (B, 32), dtype=jnp.float32)
    out = jax.block_until_ready(net_forward(x, prep))
    ref = net_forward_ref(x, params)
    assert out.shape == (B, 2)
    assert jnp.allclose(out, ref, atol=1e-5, rtol=1e-5)
    assert jnp.allclose(jnp.sum(out, axis=-1), 1.0, atol=1e-5)

    # Case 2: tiled batch with a partial (ragged) last tile, parallel grid.
    B2 = 300
    x2 = jax.random.normal(jax.random.split(xkey, 2)[1], (B2, 32), dtype=jnp.float32)
    out2 = jax.block_until_ready(net_forward(x2, prep, tb=128))
    ref2 = net_forward_ref(x2, params)
    assert out2.shape == (B2, 2)
    assert jnp.allclose(out2, ref2, atol=1e-5, rtol=1e-5)
    assert jnp.allclose(jnp.sum(out2, axis=-1), 1.0, atol=1e-5)

    print("KERNEL_OK")
</pallas_src>

<mosaic_0001>
module attributes {stable_mosaic.version = 11 : i64} {
  func.func @net_kernel(%arg0: i32, %arg1: memref<16x32xf32, #tpu.memory_space<vmem>>, %arg2: memref<16x32xf32, #tpu.memory_space<vmem>>, %arg3: memref<16x1xf32, #tpu.memory_space<vmem>>, %arg4: memref<16x16xf32, #tpu.memory_space<vmem>>, %arg5: memref<16x1xf32, #tpu.memory_space<vmem>>, %arg6: memref<8x16xf32, #tpu.memory_space<vmem>>, %arg7: memref<8x1xf32, #tpu.memory_space<vmem>>, %arg8: memref<8x8xf32, #tpu.memory_space<vmem>>, %arg9: memref<8x1xf32, #tpu.memory_space<vmem>>, %arg10: memref<1x8xf32, #tpu.memory_space<vmem>>, %arg11: memref<1x1xf32, #tpu.memory_space<vmem>>, %arg12: memref<2x16xf32, #tpu.memory_space<vmem>>) attributes {dimension_semantics = [#tpu.dimension_semantics<parallel>], iteration_bounds = array<i64: 1>, scalar_prefetch = 0 : i64, scratch_operands = 0 : i64, tpu.core_type = #tpu.core_type<tc>, window_params = [{transform_indices = @transform_0, window_bounds = array<i64: 16, 32>}, {pipeline_mode = #tpu.pipeline_mode<synchronous>, transform_indices = @transform_1, window_bounds = array<i64: 16, 32>}, {pipeline_mode = #tpu.pipeline_mode<synchronous>, transform_indices = @transform_2, window_bounds = array<i64: 16, 1>}, {pipeline_mode = #tpu.pipeline_mode<synchronous>, transform_indices = @transform_3, window_bounds = array<i64: 16, 16>}, {pipeline_mode = #tpu.pipeline_mode<synchronous>, transform_indices = @transform_4, window_bounds = array<i64: 16, 1>}, {pipeline_mode = #tpu.pipeline_mode<synchronous>, transform_indices = @transform_5, window_bounds = array<i64: 8, 16>}, {pipeline_mode = #tpu.pipeline_mode<synchronous>, transform_indices = @transform_6, window_bounds = array<i64: 8, 1>}, {pipeline_mode = #tpu.pipeline_mode<synchronous>, transform_indices = @transform_7, window_bounds = array<i64: 8, 8>}, {pipeline_mode = #tpu.pipeline_mode<synchronous>, transform_indices = @transform_8, window_bounds = array<i64: 8, 1>}, {pipeline_mode = #tpu.pipeline_mode<synchronous>, transform_indices = @transform_9, window_bounds = array<i64: 1, 8>}, {pipeline_mode = #tpu.pipeline_mode<synchronous>, transform_indices = @transform_10, window_bounds = array<i64: 1, 1>}, {transform_indices = @transform_11, window_bounds = array<i64: 2, 16>}]} {
    %c0 = arith.constant 0 : index
    %c0_0 = arith.constant 0 : index
    %0 = vector.load %arg1[%c0, %c0_0] : memref<16x32xf32, #tpu.memory_space<vmem>>, vector<16x32xf32>
    %c0_1 = arith.constant 0 : index
    %c0_2 = arith.constant 0 : index
    %1 = vector.load %arg2[%c0_1, %c0_2] : memref<16x32xf32, #tpu.memory_space<vmem>>, vector<16x32xf32>
    %cst = arith.constant dense<0.000000e+00> : vector<16x16xf32>
    %2 = tpu.matmul %1, %0, %cst {dimension_numbers = #tpu.dot_dimension_numbers<[1], [1], [0], [0], [0, 0, 1, 0], [], []>} : vector<16x32xf32>, vector<16x32xf32>, vector<16x16xf32> -> vector<16x16xf32>
    %c0_3 = arith.constant 0 : index
    %c0_4 = arith.constant 0 : index
    %3 = vector.load %arg3[%c0_3, %c0_4] : memref<16x1xf32, #tpu.memory_space<vmem>>, vector<16x1xf32>
    %4 = vector.broadcast %3 : vector<16x1xf32> to vector<16x16xf32>
    %5 = arith.addf %2, %4 : vector<16x16xf32>
    %cst_5 = arith.constant 0.000000e+00 : f32
    %6 = vector.broadcast %cst_5 : f32 to vector<16x16xf32>
    %7 = arith.maximumf %5, %6 : vector<16x16xf32>
    %c0_6 = arith.constant 0 : index
    %c0_7 = arith.constant 0 : index
    %8 = vector.load %arg4[%c0_6, %c0_7] : memref<16x16xf32, #tpu.memory_space<vmem>>, vector<16x16xf32>
    %cst_8 = arith.constant dense<0.000000e+00> : vector<16x16xf32>
    %9 = tpu.matmul %8, %7, %cst_8 {dimension_numbers = #tpu.dot_dimension_numbers<[1], [0], [0], [1], [0, 0, 1, 1], [], []>} : vector<16x16xf32>, vector<16x16xf32>, vector<16x16xf32> -> vector<16x16xf32>
    %c0_9 = arith.constant 0 : index
    %c0_10 = arith.constant 0 : index
    %10 = vector.load %arg5[%c0_9, %c0_10] : memref<16x1xf32, #tpu.memory_space<vmem>>, vector<16x1xf32>
    %11 = vector.broadcast %10 : vector<16x1xf32> to vector<16x16xf32>
    %12 = arith.addf %9, %11 : vector<16x16xf32>
    %cst_11 = arith.constant 0.000000e+00 : f32
    %13 = vector.broadcast %cst_11 : f32 to vector<16x16xf32>
    %14 = arith.maximumf %12, %13 : vector<16x16xf32>
    %c0_12 = arith.constant 0 : index
    %c0_13 = arith.constant 0 : index
    %15 = vector.load %arg6[%c0_12, %c0_13] : memref<8x16xf32, #tpu.memory_space<vmem>>, vector<8x16xf32>
    %cst_14 = arith.constant dense<0.000000e+00> : vector<8x16xf32>
    %16 = tpu.matmul %15, %14, %cst_14 {dimension_numbers = #tpu.dot_dimension_numbers<[1], [0], [0], [1], [0, 0, 1, 1], [], []>} : vector<8x16xf32>, vector<16x16xf32>, vector<8x16xf32> -> vector<8x16xf32>
    %c0_15 = arith.constant 0 : index
    %c0_16 = arith.constant 0 : index
    %17 = vector.load %arg7[%c0_15, %c0_16] : memref<8x1xf32, #tpu.memory_space<vmem>>, vector<8x1xf32>
    %18 = vector.broadcast %17 : vector<8x1xf32> to vector<8x16xf32>
    %19 = arith.addf %16, %18 : vector<8x16xf32>
    %c0_17 = arith.constant 0 : index
    %c0_18 = arith.constant 0 : index
    %20 = vector.load %arg8[%c0_17, %c0_18] : memref<8x8xf32, #tpu.memory_space<vmem>>, vector<8x8xf32>
    %cst_19 = arith.constant dense<0.000000e+00> : vector<8x16xf32>
    %21 = tpu.matmul %20, %19, %cst_19 {dimension_numbers = #tpu.dot_dimension_numbers<[1], [0], [0], [1], [0, 0, 1, 1], [], []>} : vector<8x8xf32>, vector<8x16xf32>, vector<8x16xf32> -> vector<8x16xf32>
    %c0_20 = arith.constant 0 : index
    %c0_21 = arith.constant 0 : index
    %22 = vector.load %arg9[%c0_20, %c0_21] : memref<8x1xf32, #tpu.memory_space<vmem>>, vector<8x1xf32>
    %23 = vector.broadcast %22 : vector<8x1xf32> to vector<8x16xf32>
    %24 = arith.addf %21, %23 : vector<8x16xf32>
    %cst_22 = arith.constant 0.000000e+00 : f32
    %25 = vector.broadcast %cst_22 : f32 to vector<8x16xf32>
    %26 = arith.maximumf %24, %25 : vector<8x16xf32>
    %c0_23 = arith.constant 0 : index
    %c0_24 = arith.constant 0 : index
    %27 = vector.load %arg10[%c0_23, %c0_24] : memref<1x8xf32, #tpu.memory_space<vmem>>, vector<1x8xf32>
    %cst_25 = arith.constant dense<0.000000e+00> : vector<1x16xf32>
    %28 = tpu.matmul %27, %26, %cst_25 {dimension_numbers = #tpu.dot_dimension_numbers<[1], [0], [0], [1], [0, 0, 1, 1], [], []>} : vector<1x8xf32>, vector<8x16xf32>, vector<1x16xf32> -> vector<1x16xf32>
    %c0_26 = arith.constant 0 : index
    %c0_27 = arith.constant 0 : index
    %29 = vector.load %arg11[%c0_26, %c0_27] : memref<1x1xf32, #tpu.memory_space<vmem>>, vector<1x1xf32>
    %30 = vector.broadcast %29 : vector<1x1xf32> to vector<1x16xf32>
    %31 = arith.addf %28, %30 : vector<1x16xf32>
    %cst_28 = arith.constant 0.000000e+00 : f32
    %32 = vector.broadcast %cst_28 : f32 to vector<1x16xf32>
    %33 = arith.subf %32, %31 : vector<1x16xf32>
    %34 = math.exp %33 : vector<1x16xf32>
    %cst_29 = arith.constant 1.000000e+00 : f32
    %35 = vector.broadcast %cst_29 : f32 to vector<1x16xf32>
    %36 = arith.addf %35, %34 : vector<1x16xf32>
    %cst_30 = arith.constant 1.000000e+00 : f32
    %37 = vector.broadcast %cst_30 : f32 to vector<1x16xf32>
    %38 = arith.divf %37, %36 : vector<1x16xf32>
    %cst_31 = arith.constant 1.000000e+00 : f32
    %39 = vector.broadcast %cst_31 : f32 to vector<1x16xf32>
    %40 = arith.subf %39, %38 : vector<1x16xf32>
    %41 = tpu.concatenate %40, %38 in 0 : vector<1x16xf32>, vector<1x16xf32> -> vector<2x16xf32>
    %c0_32 = arith.constant 0 : index
    %c0_33 = arith.constant 0 : index
    %42 = vector.load %arg12[%c0_32, %c0_33] : memref<2x16xf32, #tpu.memory_space<vmem>>, vector<2x16xf32>
    tpu.vector_store %arg12[%c0_32, %c0_33], %41 {strides = array<i32>} : memref<2x16xf32, #tpu.memory_space<vmem>>, vector<2x16xf32>,
    return
  }
  func.func @transform_0(%arg0: i32) -> (i32, i32) {
    %c0_i32 = arith.constant 0 : i32
    %c0_i32_0 = arith.constant 0 : i32
    return %arg0, %c0_i32 : i32, i32
  }
  func.func @transform_1(%arg0: i32) -> (i32, i32) {
    %c0_i32 = arith.constant 0 : i32
    %c0_i32_0 = arith.constant 0 : i32
    %c0_i32_1 = arith.constant 0 : i32
    return %c0_i32, %c0_i32_0 : i32, i32
  }
  func.func @transform_2(%arg0: i32) -> (i32, i32) {
    %c0_i32 = arith.constant 0 : i32
    %c0_i32_0 = arith.constant 0 : i32
    %c0_i32_1 = arith.constant 0 : i32
    return %c0_i32, %c0_i32_0 : i32, i32
  }
  func.func @transform_3(%arg0: i32) -> (i32, i32) {
    %c0_i32 = arith.constant 0 : i32
    %c0_i32_0 = arith.constant 0 : i32
    %c0_i32_1 = arith.constant 0 : i32
    return %c0_i32, %c0_i32_0 : i32, i32
  }
  func.func @transform_4(%arg0: i32) -> (i32, i32) {
    %c0_i32 = arith.constant 0 : i32
    %c0_i32_0 = arith.constant 0 : i32
    %c0_i32_1 = arith.constant 0 : i32
    return %c0_i32, %c0_i32_0 : i32, i32
  }
  func.func @transform_5(%arg0: i32) -> (i32, i32) {
    %c0_i32 = arith.constant 0 : i32
    %c0_i32_0 = arith.constant 0 : i32
    %c0_i32_1 = arith.constant 0 : i32
    return %c0_i32, %c0_i32_0 : i32, i32
  }
  func.func @transform_6(%arg0: i32) -> (i32, i32) {
    %c0_i32 = arith.constant 0 : i32
    %c0_i32_0 = arith.constant 0 : i32
    %c0_i32_1 = arith.constant 0 : i32
    return %c0_i32, %c0_i32_0 : i32, i32
  }
  func.func @transform_7(%arg0: i32) -> (i32, i32) {
    %c0_i32 = arith.constant 0 : i32
    %c0_i32_0 = arith.constant 0 : i32
    %c0_i32_1 = arith.constant 0 : i32
    return %c0_i32, %c0_i32_0 : i32, i32
  }
  func.func @transform_8(%arg0: i32) -> (i32, i32) {
    %c0_i32 = arith.constant 0 : i32
    %c0_i32_0 = arith.constant 0 : i32
    %c0_i32_1 = arith.constant 0 : i32
    return %c0_i32, %c0_i32_0 : i32, i32
  }
  func.func @transform_9(%arg0: i32) -> (i32, i32) {
    %c0_i32 = arith.constant 0 : i32
    %c0_i32_0 = arith.constant 0 : i32
    %c0_i32_1 = arith.constant 0 : i32
    return %c0_i32, %c0_i32_0 : i32, i32
  }
  func.func @transform_10(%arg0: i32) -> (i32, i32) {
    %c0_i32 = arith.constant 0 : i32
    %c0_i32_0 = arith.constant 0 : i32
    %c0_i32_1 = arith.constant 0 : i32
    return %c0_i32, %c0_i32_0 : i32, i32
  }
  func.func @transform_11(%arg0: i32) -> (i32, i32) {
    %c0_i32 = arith.constant 0 : i32
    %c0_i32_0 = arith.constant 0 : i32
    return %c0_i32, %arg0 : i32, i32
  }
}

</mosaic_0001>

<bundles_post_ra>
// kernel: tpu_custom_call.1
= control target key start
LH: loop header
LB: loop body
LE: loop exit
PB: predicated region body
PF: predicated region fallthrough
CT: control target
= control target key end

     0   :  { %s480_s0 = inlined_call_operand.vmem [shape: f32[16,32], index: 0, kind: input, shape index: {}]   ;;  %s481_s1 = inlined_call_operand.vmem [shape: f32[16,32], index: 1, kind: input, shape index: {}]   ;;  %s482_s2 = inlined_call_operand.vmem [shape: f32[16,1], index: 2, kind: input, shape index: {}]   ;;  %s483_s3 = inlined_call_operand.vmem [shape: f32[16,16], index: 3, kind: input, shape index: {}]   ;;  %s484_s4 = inlined_call_operand.vmem [shape: f32[16,1], index: 4, kind: input, shape index: {}]   ;;  %s485_s5 = inlined_call_operand.vmem [shape: f32[8,16], index: 5, kind: input, shape index: {}]   ;;  %s486_s6 = inlined_call_operand.vmem [shape: f32[8,1], index: 6, kind: input, shape index: {}]   ;;  %s487_s7 = inlined_call_operand.hbm [shape: f32[8,8], index: 7, kind: input, shape index: {}]   ;;  %s488_s8 = inlined_call_operand.vmem [shape: f32[8,1], index: 8, kind: input, shape index: {}]   ;;  %s489_s9 = inlined_call_operand.vmem [shape: f32[1,8], index: 9, kind: input, shape index: {}]   ;;  %s490_s10 = inlined_call_operand.<no memory space> [shape: f32[1,1], index: 10, kind: input, shape index: {}]   ;;  %s491_s11 = inlined_call_operand.hbm [shape: f32[2,16], index: 11, kind: output, shape index: {}]  }
   0x1   :  { %v16_v0 = vstv %s490_s10 }
   0x2   :  { %17 = vst [vmem:[#allocation2] sm:$0x1] %v16_v0 }
   0x3   :  { %18 = vsyncpa [#allocation4], 0 }
   0x4   :  { %19 = vsyncpa [#allocation5], 0  ;;  %s39_s21 = sshll.u32 %s487_s7, 4  ;;  %s363_s22 = smov [#allocation3]   ;;  %s40_s21 = int_to_ptr.hbm [resolvable:$true] %s39_s21 }
   0x5   :  { %s41_s23 = sshll.u32 %s363_s22, 4  ;;  %s42_s23 = int_to_ptr.vmem [resolvable:$true] %s41_s23 }
   0x6   :  { %44 = dma.hbm_to_vmem [thread:$0]  %s40_s21, 128, %s42_s23, [#allocation4]  }
   0x7   :  { %359 = dma.done.wait [#allocation4], 128  }
   0x8   :  { %360 = vsyncadd [#allocation4], 4294967168  ;;  %v364_v1 = vmov 0   ;;  %vm71_vm0 = vcmask 261120   ;;  %v56_v2 = vld [vmem:[%s480_s0 + $0x8] sm:$0xff]  ;;  %v55_v4 = vld [vmem:[%s480_s0] sm:$0xff] }
   0x9   :  { %304 = vset.pattern.permute.xlu0 %v364_v1  ;;  %305 = vset.pattern.permute.xlu1 %v364_v1  ;;  %v60_v3 = vld [vmem:[%s482_s2 + $0x8] sm:$0xff]  ;;  %v57_v5 = vld [vmem:[%s481_s1] sm:$0xff]  ;;  %vm123_vm1 = vcmask 130048   ;;  %vm192_vm2 = vcmask 64512   ;;  %s282_s25 = sshll.u32 %s491_s11, 4  ;;  %vm271_vm7 = vcmask 1040384   ;;  %s283_s25 = int_to_ptr.hbm [resolvable:$true] %s282_s25 }
   0xa   :  { %306 = vset.pattern.permute.xlu2 %v364_v1  ;;  %292 = vmatpush.xpose.msk.msra.mxu0 %vm71_vm0, %v56_v2  ;;  %v59_v6 = vld [vmem:[%s482_s2] sm:$0xff]  ;;  %v58_v7 = vld [vmem:[%s481_s1 + $0x8] sm:$0xff]  ;;  %vm273_vm8 = vcmask 123904  }
   0xb   :  { %68 = vperm.xlu0 %304, %v60_v3   ;;  %v218_v8 = vld [vmem:[#allocation2] sm:$0x1]  ;;  %v112_v9 = vld [vmem:[%s484_s4 + $0x8] sm:$0xff] }
   0xc   :  { %120 = vperm.xlu1 %305, %v112_v9   ;;  %v111_v10 = vld [vmem:[%s484_s4] sm:$0xff]  ;;  %v110_v20 = vld [vmem:[%s483_s3 + $0x8] sm:$0xff] }
   0xd   :  { %v109_v19 = vld [vmem:[%s483_s3] sm:$0xff] }
   0xe   :  { %293 = vmatpush.xpose.msk.msra.mxu0 %vm71_vm0, %v55_v4  ;;  %v156_v21 = vld [vmem:[%s486_s6] sm:$0xff] }
   0xf   :  { %159 = vperm.xlu2 %306, %v156_v21   ;;  %v186_v22 = vld [vmem:[%s488_s8] sm:$0xff] }
  0x10   :  { %v155_v31 = vld [vmem:[%s485_s5] sm:$0xff]  ;;  %s365_s5 = smov [#allocation6]  }
  0x11   :  { %294 = vmatmul.msk.f32.vlgmr.msra.gmra.mxu0 %vm71_vm0, %v57_v5  ;;  %v185_v35 = vld [vmem:[#allocation3] sm:$0xff]  ;;  %v217_v40 = vld [vmem:[%s489_s9] sm:$0x1]  ;;  %s280_s9 = sshll.u32 %s365_s5, 4  ;;  %s281_s9 = int_to_ptr.vmem [resolvable:$true] %s280_s9 }
  0x13   :  { %63 = vperm.xlu0 %304, %v59_v6  }
  0x14   :  { %115 = vperm.xlu1 %305, %v111_v10  }
  0x17   :  { %189 = vperm.xlu2 %306, %v186_v22  }
  0x19   :  { %295 = vmatmul.msk.f32.gmra.mxu0 %vm71_vm0, %v58_v7 }
  0x1b   :  { %221 = vperm.xlu0 %304, %v218_v8  }
  0x69   :  { %v160_v32 = vpop.permute.xlu2 %159 }
  0x71   :  { %v190_v36 = vpop.permute.xlu2 %189 }
  0x7d   :  { %v69_v11 = vpop.permute.xlu0 %68 }
  0x7e   :  { %v121_v23 = vpop.permute.xlu1 %120 }
  0x85   :  { %v64_v13 = vpop.permute.xlu0 %63 }
  0x86   :  { %v116_v25 = vpop.permute.xlu1 %115 }
  0x8d   :  { %v222_v41 = vpop.permute.xlu0 %221 }
  0x8e   :  { %v101_v12 = vpop.f32.mrf.mxu0  ;;  %v224_v42 = vperm.slane %v222_v41, 0 }
  0x8f   :  { %v102_v15 = vadd.f32 %v101_v12, %v64_v13 }
  0x91   :  { %v107_v18 = vmax.f32 %v102_v15, 0.0 }
  0x96   :  { %v104_v14 = vpop.f32.mrf.mxu0 }
  0x97   :  { %v105_v16 = vadd.f32 %v104_v14, %v69_v11 }
  0x99   :  { %v108_v17 = vmax.f32 %v105_v16, 0.0 }
  0x9b   :  { %144 = vmatpush.msra.mxu1 %v108_v17 }
  0x9d   :  { %145 = vmatpush.msra.mxu1 %v107_v18 }
  0x9e   :  { %296 = vmatmul.msk.f32.vlgmr.msra.gmra.mxu1 %vm123_vm1, %v109_v19 }
  0xa6   :  { %297 = vmatmul.msk.f32.gmra.mxu1 %vm123_vm1, %v110_v20 }
 0x11b   :  { %v147_v24 = vpop.f32.mrf.mxu1 }
 0x11c   :  { %v148_v27 = vadd.f32 %v147_v24, %v116_v25 }
 0x11e   :  { %v153_v30 = vmax.f32 %v148_v27, 0.0 }
 0x123   :  { %v150_v26 = vpop.f32.mrf.mxu1 }
 0x124   :  { %v151_v28 = vadd.f32 %v150_v26, %v121_v23 }
 0x126   :  { %v154_v29 = vmax.f32 %v151_v28, 0.0 }
 0x128   :  { %179 = vmatpush.msra.mxu2 %v154_v29 }
 0x12a   :  { %180 = vmatpush.msra.mxu2 %v153_v30 }
 0x12b   :  { %298 = vmatmul.msk.f32.vlgmr.msra.gmra.mxu2 %vm123_vm1, %v155_v31 }
 0x1ae   :  { %v182_v33 = vpop.f32.mrf.mxu2 }
 0x1af   :  { %v183_v34 = vadd.f32 %v182_v33, %v160_v32 }
 0x1b1   :  { %211 = vmatpush.msra.mxu3 %v183_v34 }
 0x1b2   :  { %299 = vmatmul.msk.f32.vlgmr.msra.gmra.mxu3 %vm192_vm2, %v185_v35 }
 0x235   :  { %v213_v37 = vpop.f32.mrf.mxu3 }
 0x236   :  { %v214_v38 = vadd.f32 %v213_v37, %v190_v36 }
 0x238   :  { %v216_v39 = vmax.f32 %v214_v38, 0.0 }
 0x23a   :  { %243 = vmatpush.msrb.mxu3 %v216_v39 }
 0x23b   :  { %300 = vmatmul.msk.f32.vlgmr.msrb.gmra.mxu3 %vm192_vm2, %v217_v40 }
 0x2be   :  { %v245_v43 = vpop.f32.mrf.mxu3 }
 0x2bf   :  { %v246_v44 = vadd.f32 %v245_v43, %v224_v42 }
 0x2c1   :  { %v248_v45 = vsub.f32 0.0, %v246_v44 }
 0x2c3   :  { %v249_v46 = vmul.f32 1.442695, %v248_v45 }
 0x2c5   :  { %307 = vpow2.f32 %v249_v46 }
 0x2cb   :  { %v308_v47 = vpop.eup %307 }
 0x2cc   :  { %v251_v48 = vadd.f32 1.0, %v308_v47 }
 0x2ce   :  { %309 = vrcp.f32 %v251_v48  ;;  %v263_v52 = vand.u32 2147483648, %v251_v48  ;;  %v261_v54 = vand.u32 2147483647, %v251_v48  ;;  %vm257_vm4 = vweird.f32 %v251_v48 }
 0x2d0   :  { %v264_v56 = vor.u32 1.1754944e-38, %v263_v52  ;;  %vm262_vm6 = vcmp.eq.f32.partialorder %v261_v54, 8.507059e+37 }
 0x2d4   :  { %v310_v49 = vpop.eup %309 }
 0x2d5   :  { %v253_v50 = vmul.f32 %v310_v49, %v251_v48  ;;  %vm258_vm3 = vweird.f32 %v310_v49 }
 0x2d6   :  { %vm259_vm5 = vmor %vm257_vm4, %vm258_vm3 }
 0x2d7   :  { %v254_v51 = vsub.f32 1.0, %v253_v50 }
 0x2d9   :  { %v255_v53 = vmul.f32 %v310_v49, %v254_v51 }
 0x2db   :  { %v256_v55 = vadd.f32 %v310_v49, %v255_v53 }
 0x2dd   :  { %v260_v57 = vsel %vm259_vm5, %v310_v49, %v256_v55 }
 0x2de   :  { %v265_v58 = vsel %vm262_vm6, %v264_v56, %v260_v57 }
 0x2df   :  { %v267_v59 = vsub.f32 1.0, %v265_v58  ;;  %v269_v60 = vrot.slane %v265_v58, 7 }
 0x2e1   :  { %v272_v61 = vsel %vm271_vm7, %v267_v59, %v269_v60 }
 0x2e2   :  { %274 = vst.msk [vmem:[#allocation6] sm:$0x3] %vm273_vm8, %v272_v61 }
 0x2e3   :  { %285 = dma.vmem_to_hbm [thread:$0]  %s281_s9, 32, %s283_s25, [#allocation5]  }
 0x2e4   :  { %361 = dma.done.wait [#allocation5], 32  }
 0x2e5   :  { %362 = vsyncadd [#allocation5], 4294967264 }
 0x2e6   :  { %290 = vsyncpa [#allocation4], 1 }
 0x2e7   :  { %291 = vsyncpa [#allocation5], 1 }

</bundles_post_ra>
